<compile_context>
chip_gen: v7x
topology: tpu7x:2x2x1
jax: 0.10.0
libtpu: 0.0.40
codegen_flags: <defaults>
</compile_context>

<pallas_src>
import jax
import jax.numpy as jnp
from jax.experimental import pallas as pl
from jax.experimental.pallas import tpu as pltpu


def _round_up(n, m):
    return ((n + m - 1) // m) * m


def linear_kernel(x_ref, wt_ref, b_ref, o_ref):
    # x_ref:  (TB, IN)   VMEM tile
    # wt_ref: (IN, OUT)  VMEM tile (already-transposed weight, resident)
    # b_ref:  (1, OUT)   VMEM tile (bias, broadcast over rows, resident)
    # o_ref:  (TB, OUT)  VMEM tile
    acc = jnp.dot(x_ref[...], wt_ref[...], preferred_element_type=jnp.float32)
    o_ref[...] = (acc + b_ref[...].astype(jnp.float32)).astype(o_ref.dtype)


def _pick_tb(batch):
    # Large tiles amortize per-grid-step overhead (measured ~85% of HBM
    # roofline at 512+ rows vs ~29% at tiny tiles).
    tb = min(1024, _round_up(batch, 8))
    # v7x has 2 TensorCores per chip: give the 'parallel' batch axis at least
    # 2 grid steps whenever there is enough work to split.
    if batch >= 512 and pl.cdiv(batch, tb) < 2:
        tb = _round_up(pl.cdiv(batch, 2), 8)
    return tb


def linear_htoh(x, weight, bias, *, tb=None, use_bf16_inputs=False,
                force_pallas=False):
    """y = x @ weight.T + bias  (forward of nn.Linear(128, 128)).

    x: (B, IN) f32; weight: (OUT, IN) f32; bias: (OUT,) f32.
    """
    B, IN = x.shape
    OUT = weight.shape[0]
    assert weight.shape == (OUT, IN)
    out_dtype = x.dtype

    # Tiny batches: XLA's fused gemm+bias beats custom-call + pipeline
    # prologue overhead at this size on every TPU generation.
    if not force_pallas and B * IN * x.dtype.itemsize < (64 << 10):
        return (x @ weight.T + bias).astype(out_dtype)

    align = 16 if use_bf16_inputs else 8
    if tb is None:
        tb = _pick_tb(B)
    tb = max(align, _round_up(min(tb, max(B, 1)), align))

    # Ragged batch: pad up to a multiple of the tile, slice back afterwards,
    # so callers never have to shrink tb just to make B divide evenly.
    Bp = _round_up(B, tb)
    x_p = jnp.pad(x, ((0, Bp - B), (0, 0))) if Bp != B else x

    wt = weight.T                      # (IN, OUT): kernel does (TB,IN)x(IN,OUT)
    b2 = bias.reshape(1, OUT)          # 2D, lane-aligned bias tile

    if use_bf16_inputs:
        # Halves HBM traffic for x/weight and feeds the MXU its native bf16
        # path on v6e/v7x. f32 accumulation is kept; numerics shift ~1e-3.
        x_p = x_p.astype(jnp.bfloat16)
        wt = wt.astype(jnp.bfloat16)

    grid = (Bp // tb,)

    # VMEM budget: double-buffered x & y tiles + (double-buffered) resident
    # weight and bias. Keep the scoped limit well under 64 MiB (v7x physical).
    in_itemsize = x_p.dtype.itemsize
    out_itemsize = jnp.dtype(out_dtype).itemsize
    tile_bytes = (2 * tb * (IN * in_itemsize + OUT * out_itemsize)
                  + 2 * (IN * OUT * in_itemsize + OUT * 4))
    vmem_limit = int(min(max(2 * tile_bytes, 32 << 20), 48 << 20))

    cost = pl.CostEstimate(
        flops=2 * Bp * IN * OUT,
        transcendentals=0,
        bytes_accessed=(Bp * IN + IN * OUT) * in_itemsize
                       + OUT * 4 + Bp * OUT * out_itemsize,
    )

    y_p = pl.pallas_call(
        linear_kernel,
        out_shape=jax.ShapeDtypeStruct((Bp, OUT), out_dtype),
        grid_spec=pl.GridSpec(
            grid=grid,
            in_specs=[
                pl.BlockSpec((tb, IN), lambda i: (i, 0)),
                pl.BlockSpec((IN, OUT), lambda i: (0, 0)),
                pl.BlockSpec((1, OUT), lambda i: (0, 0)),
            ],
            out_specs=pl.BlockSpec((tb, OUT), lambda i: (i, 0)),
        ),
        compiler_params=pltpu.CompilerParams(
            dimension_semantics=("parallel",),
            vmem_limit_bytes=vmem_limit,
        ),
        cost_estimate=cost,
    )(x_p, wt, b2)

    return y_p[:B] if Bp != B else y_p


if __name__ == "__main__":
    key = jax.random.PRNGKey(0)
    kx, kw, kb = jax.random.split(key, 3)

    IN, OUT = 128, 128
    B = 203  # small, ragged batch: exercises padding + tail slicing

    # Deterministic synthetic parameters (same shapes as nn.Linear(128, 128)).
    bound = 1.0 / (IN ** 0.5)
    weight = jax.random.uniform(kw, (OUT, IN), jnp.float32, -bound, bound)
    bias = jax.random.uniform(kb, (OUT,), jnp.float32, -bound, bound)
    x = jax.random.normal(kx, (B, IN), jnp.float32)

    y_ref = x @ weight.T + bias

    # Pallas path, auto-picked tile (single large tile, padded batch).
    y = jax.block_until_ready(linear_htoh(x, weight, bias, force_pallas=True))
    assert y.shape == (B, OUT)
    assert jnp.allclose(y, y_ref, atol=1e-5, rtol=1e-5)

    # Pallas path, explicit smaller tile -> multi-step pipelined grid.
    y2 = jax.block_until_ready(
        linear_htoh(x, weight, bias, tb=64, force_pallas=True))
    assert jnp.allclose(y2, y_ref, atol=1e-5, rtol=1e-5)

    print("KERNEL_OK")
</pallas_src>

<mosaic_0001>
module attributes {stable_mosaic.version = 11 : i64} {
  func.func @linear_kernel(%arg0: i32, %arg1: memref<208x128xf32, #tpu.memory_space<vmem>>, %arg2: memref<128x128xf32, #tpu.memory_space<vmem>>, %arg3: memref<1x128xf32, #tpu.memory_space<vmem>>, %arg4: memref<208x128xf32, #tpu.memory_space<vmem>>) attributes {dimension_semantics = [#tpu.dimension_semantics<parallel>], iteration_bounds = array<i64: 1>, scalar_prefetch = 0 : i64, scratch_operands = 0 : i64, tpu.core_type = #tpu.core_type<tc>, window_params = [{transform_indices = @transform_0, window_bounds = array<i64: 208, 128>}, {pipeline_mode = #tpu.pipeline_mode<synchronous>, transform_indices = @transform_1, window_bounds = array<i64: 128, 128>}, {pipeline_mode = #tpu.pipeline_mode<synchronous>, transform_indices = @transform_2, window_bounds = array<i64: 1, 128>}, {transform_indices = @transform_3, window_bounds = array<i64: 208, 128>}]} {
    %c0 = arith.constant 0 : index
    %c0_0 = arith.constant 0 : index
    %0 = vector.load %arg1[%c0, %c0_0] : memref<208x128xf32, #tpu.memory_space<vmem>>, vector<208x128xf32>
    %c0_1 = arith.constant 0 : index
    %c0_2 = arith.constant 0 : index
    %1 = vector.load %arg2[%c0_1, %c0_2] : memref<128x128xf32, #tpu.memory_space<vmem>>, vector<128x128xf32>
    %cst = arith.constant dense<0.000000e+00> : vector<208x128xf32>
    %2 = tpu.matmul %0, %1, %cst {dimension_numbers = #tpu.dot_dimension_numbers<[1], [0], [0], [1], [0, 0, 1, 1], [], []>} : vector<208x128xf32>, vector<128x128xf32>, vector<208x128xf32> -> vector<208x128xf32>
    %c0_3 = arith.constant 0 : index
    %c0_4 = arith.constant 0 : index
    %3 = vector.load %arg3[%c0_3, %c0_4] : memref<1x128xf32, #tpu.memory_space<vmem>>, vector<1x128xf32>
    %4 = vector.broadcast %3 : vector<1x128xf32> to vector<208x128xf32>
    %5 = arith.addf %2, %4 : vector<208x128xf32>
    %c0_5 = arith.constant 0 : index
    %c0_6 = arith.constant 0 : index
    %6 = vector.load %arg4[%c0_5, %c0_6] : memref<208x128xf32, #tpu.memory_space<vmem>>, vector<208x128xf32>
    tpu.vector_store %arg4[%c0_5, %c0_6], %5 {strides = array<i32>} : memref<208x128xf32, #tpu.memory_space<vmem>>, vector<208x128xf32>,
    return
  }
  func.func @transform_0(%arg0: i32) -> (i32, i32) {
    %c0_i32 = arith.constant 0 : i32
    %c0_i32_0 = arith.constant 0 : i32
    return %arg0, %c0_i32 : i32, i32
  }
  func.func @transform_1(%arg0: i32) -> (i32, i32) {
    %c0_i32 = arith.constant 0 : i32
    %c0_i32_0 = arith.constant 0 : i32
    %c0_i32_1 = arith.constant 0 : i32
    return %c0_i32, %c0_i32_0 : i32, i32
  }
  func.func @transform_2(%arg0: i32) -> (i32, i32) {
    %c0_i32 = arith.constant 0 : i32
    %c0_i32_0 = arith.constant 0 : i32
    %c0_i32_1 = arith.constant 0 : i32
    return %c0_i32, %c0_i32_0 : i32, i32
  }
  func.func @transform_3(%arg0: i32) -> (i32, i32) {
    %c0_i32 = arith.constant 0 : i32
    %c0_i32_0 = arith.constant 0 : i32
    return %arg0, %c0_i32 : i32, i32
  }
}

</mosaic_0001>

<bundles_post_ra>
// kernel: tpu_custom_call.1
= control target key start
LH: loop header
LB: loop body
LE: loop exit
PB: predicated region body
PF: predicated region fallthrough
CT: control target
= control target key end

     0   :  { %8 = vsyncpa [#allocation3], 0  ;;  %s671_s0 = inlined_call_operand.hbm [shape: f32[208,128], index: 0, kind: input, shape index: {}]   ;;  %s672_s1 = inlined_call_operand.hbm [shape: f32[128,128], index: 1, kind: input, shape index: {}]   ;;  %s673_s2 = inlined_call_operand.vmem [shape: f32[1,128], index: 2, kind: input, shape index: {}]   ;;  %s674_s3 = inlined_call_operand.hbm [shape: f32[208,128], index: 3, kind: output, shape index: {}]  }
   0x1   :  { %9 = vsyncpa [#allocation6], 0 }
   0x2   :  { %10 = vsyncpa [#allocation4], 0  ;;  %s570_s12 = smov [#allocation2]   ;;  %s498_s16 = scalar_lea.hbm %s671_s0, 3328 }
   0x3   :  { %s16_s13 = sshll.u32 %s570_s12, 4  ;;  %p499_p0 = scmp.ne.s32.totalorder %s671_s0, %s498_s16  ;;  %s17_s13 = int_to_ptr.vmem [resolvable:$true] %s16_s13 }
   0x4   :  { %p502_p1 = scmp.lt.u32.totalorder %s498_s16, %s671_s0 }
   0x6   :  { %p504_p2 = pnand %p502_p1, %p499_p0 }
   0x8   :  { %507 = shalt.err (!%p504_p2)
}
   0x9   :  { %s508_s21 = scalar_lea.vmem %s17_s13, 3328  ;;  %p513_p4 = scmp.lt.s32.totalorder %s17_s13, %s17_s13 }
   0xa   :  { %p509_p3 = scmp.ne.s32.totalorder %s17_s13, %s508_s21  ;;  %p514_p5 = scmp.lt.s32.totalorder %s508_s21, %s508_s21 }
   0xc   :  { %p515_p6 = por %p514_p5, %p513_p4 }
   0xe   :  { %p516_p7 = pnand %p515_p6, %p509_p3 }
  0x10   :  { %519 = shalt.err (!%p516_p7)
}
  0x11   :  { %s571_s22 = smov 128   ;;  %s572_s23 = smov 8  }
  0x12   :  { %22 = dma.hbm_to_vmem [thread:$0]  %s671_s0, 3328, %s17_s13, [#allocation3], %s571_s22, %s571_s22, %s572_s23  }
  0x13   :  { %s573_s26 = smov [#allocation5]   ;;  %s520_s30 = scalar_lea.hbm %s672_s1, 2048 }
  0x14   :  { %s28_s27 = sshll.u32 %s573_s26, 4  ;;  %p521_p8 = scmp.ne.s32.totalorder %s672_s1, %s520_s30  ;;  %s29_s27 = int_to_ptr.vmem [resolvable:$true] %s28_s27 }
  0x15   :  { %p524_p9 = scmp.lt.u32.totalorder %s520_s30, %s672_s1 }
  0x17   :  { %p526_p10 = pnand %p524_p9, %p521_p8 }
  0x19   :  { %529 = shalt.err (!%p526_p10)
}
  0x1a   :  { %s530_s8 = scalar_lea.vmem %s29_s27, 2048  ;;  %p535_p12 = scmp.lt.s32.totalorder %s29_s27, %s29_s27 }
  0x1b   :  { %p531_p11 = scmp.ne.s32.totalorder %s29_s27, %s530_s8  ;;  %p536_p13 = scmp.lt.s32.totalorder %s530_s8, %s530_s8 }
  0x1d   :  { %p537_p0 = por %p536_p13, %p535_p12 }
  0x1f   :  { %p538_p1 = pnand %p537_p0, %p531_p11 }
  0x21   :  { %541 = shalt.err (!%p538_p1)
}
  0x22   :  { %34 = dma.hbm_to_vmem [thread:$0]  %s672_s1, 2048, %s29_s27, [#allocation6], %s571_s22, %s571_s22, %s572_s23  }
  0x23   :  { %564 = dma.done.wait [#allocation3], 3328  }
  0x24   :  { %565 = vsyncadd [#allocation3], 4294963968 }
  0x25   :  { %566 = dma.done.wait [#allocation6], 2048  }
  0x26   :  { %567 = vsyncadd [#allocation6], 4294965248  ;;  %v69_v0 = vld [vmem:[#allocation5] sm:$0xff]  ;;  %v70_v1 = vld [vmem:[#allocation5 + $0x8] sm:$0xff] }
  0x27   :  { %v71_v2 = vld [vmem:[#allocation5 + $0x10] sm:$0xff]  ;;  %v445_v3 = vpack.c.bf16 %v70_v1, %v69_v0  ;;  %v72_v4 = vld [vmem:[#allocation5 + $0x18] sm:$0xff]  ;;  %v73_v6 = vld [vmem:[#allocation5 + $0x20] sm:$0xff] }
  0x28   :  { %v449_v5 = vpack.c.bf16 %v72_v4, %v71_v2  ;;  %v74_v7 = vld [vmem:[#allocation5 + $0x28] sm:$0xff]  ;;  %v43_v9 = vld [vmem:[#allocation2] sm:$0xff]  ;;  %v76_v11 = vld [vmem:[#allocation5 + $0x38] sm:$0xff] }
  0x29   :  { %446 = vmatprep.subr.bf16.mxu0 %v445_v3  ;;  %477 = vmatprep.subr.bf16.mxu1 %v445_v3  ;;  %v453_v8 = vpack.c.bf16 %v74_v7, %v73_v6  ;;  %v75_v10 = vld [vmem:[#allocation5 + $0x30] sm:$0xff]  ;;  %v57_v12 = vld [vmem:[#allocation2 + $0x70] sm:$0xff]  ;;  %v78_v15 = vld [vmem:[#allocation5 + $0x48] sm:$0xff] }
  0x2a   :  { %448 = vmatpush3.bf16.msra.mxu0 %v445_v3  ;;  %485 = vmatpush3.bf16.msra.mxu1 %v445_v3  ;;  %v457_v13 = vpack.c.bf16 %v76_v11, %v75_v10  ;;  %v77_v14 = vld [vmem:[#allocation5 + $0x40] sm:$0xff]  ;;  %v79_v17 = vld [vmem:[#allocation5 + $0x50] sm:$0xff]  ;;  %v80_v18 = vld [vmem:[#allocation5 + $0x58] sm:$0xff] }
  0x2b   :  { %450 = vmatprep.subr.bf16.mxu0 %v449_v5  ;;  %478 = vmatprep.subr.bf16.mxu1 %v449_v5  ;;  %v461_v16 = vpack.c.bf16 %v78_v15, %v77_v14  ;;  %v465_v19 = vpack.c.bf16 %v80_v18, %v79_v17  ;;  %v81_v20 = vld [vmem:[#allocation5 + $0x60] sm:$0xff]  ;;  %v82_v21 = vld [vmem:[#allocation5 + $0x68] sm:$0xff]  ;;  %v83_v23 = vld [vmem:[#allocation5 + $0x70] sm:$0xff] }
  0x2c   :  { %406 = vmatprep.mubr.f32.mxu0 %v43_v9  ;;  %427 = vmatprep.mubr.f32.mxu1 %v57_v12  ;;  %v469_v22 = vpack.c.bf16 %v82_v21, %v81_v20  ;;  %v84_v24 = vld [vmem:[#allocation5 + $0x78] sm:$0xff]  ;;  %v58_v27 = vld [vmem:[#allocation2 + $0x78] sm:$0xff]  ;;  %v45_v28 = vld [vmem:[#allocation2 + $0x10] sm:$0xff] }
  0x2d   :  { %v473_v25 = vpack.c.bf16 %v84_v24, %v83_v23  ;;  %v44_v26 = vld [vmem:[#allocation2 + $0x8] sm:$0xff]  ;;  %v59_v29 = vld [vmem:[#allocation2 + $0x80] sm:$0xff]  ;;  %v46_v30 = vld [vmem:[#allocation2 + $0x18] sm:$0xff] }
  0x2e   :  { %452 = vmatpush3.bf16.msra.mxu0 %v449_v5  ;;  %486 = vmatpush3.bf16.msra.mxu1 %v449_v5  ;;  %v60_v31 = vld [vmem:[#allocation2 + $0x88] sm:$0xff]  ;;  %v47_v32 = vld [vmem:[#allocation2 + $0x20] sm:$0xff]  ;;  %v61_v33 = vld [vmem:[#allocation2 + $0x90] sm:$0xff] }
  0x2f   :  { %454 = vmatprep.subr.bf16.mxu0 %v453_v8  ;;  %479 = vmatprep.subr.bf16.mxu1 %v453_v8  ;;  %v48_v34 = vld [vmem:[#allocation2 + $0x28] sm:$0xff]  ;;  %v62_v35 = vld [vmem:[#allocation2 + $0x98] sm:$0xff]  ;;  %v49_v36 = vld [vmem:[#allocation2 + $0x30] sm:$0xff] }
  0x30   :  { %v63_v37 = vld [vmem:[#allocation2 + $0xa0] sm:$0xff]  ;;  %v50_v38 = vld [vmem:[#allocation2 + $0x38] sm:$0xff]  ;;  %v64_v39 = vld [vmem:[#allocation2 + $0xa8] sm:$0xff] }
  0x31   :  { %v51_v40 = vld [vmem:[#allocation2 + $0x40] sm:$0xff]  ;;  %v65_v41 = vld [vmem:[#allocation2 + $0xb0] sm:$0xff]  ;;  %v52_v42 = vld [vmem:[#allocation2 + $0x48] sm:$0xff] }
  0x32   :  { %456 = vmatpush3.bf16.msra.mxu0 %v453_v8  ;;  %487 = vmatpush3.bf16.msra.mxu1 %v453_v8  ;;  %v66_v43 = vld [vmem:[#allocation2 + $0xb8] sm:$0xff]  ;;  %v53_v44 = vld [vmem:[#allocation2 + $0x50] sm:$0xff]  ;;  %v67_v45 = vld [vmem:[#allocation2 + $0xc0] sm:$0xff] }
  0x33   :  { %458 = vmatprep.subr.bf16.mxu0 %v457_v13  ;;  %480 = vmatprep.subr.bf16.mxu1 %v457_v13  ;;  %v54_v46 = vld [vmem:[#allocation2 + $0x58] sm:$0xff]  ;;  %v68_v47 = vld [vmem:[#allocation2 + $0xc8] sm:$0xff]  ;;  %v55_v48 = vld [vmem:[#allocation2 + $0x60] sm:$0xff] }
  0x34   :  { %v56_v49 = vld [vmem:[#allocation2 + $0x68] sm:$0xff]  ;;  %v628_v50 = vld [vmem:[%s673_s2] ss:$0 sm:$0xff]  ;;  %s574_s2 = smov [#allocation7]  }
  0x35   :  { %s318_s11 = sshll.u32 %s574_s2, 4  ;;  %s319_s11 = int_to_ptr.vmem [resolvable:$true] %s318_s11 }
  0x36   :  { %460 = vmatpush3.bf16.msra.mxu0 %v457_v13  ;;  %488 = vmatpush3.bf16.msra.mxu1 %v457_v13  ;;  %s542_s12 = scalar_lea.vmem %s319_s11, 3328  ;;  %p547_p3 = scmp.lt.s32.totalorder %s319_s11, %s319_s11 }
  0x37   :  { %462 = vmatprep.subr.bf16.mxu0 %v461_v16  ;;  %481 = vmatprep.subr.bf16.mxu1 %v461_v16  ;;  %p543_p2 = scmp.ne.s32.totalorder %s319_s11, %s542_s12  ;;  %p548_p4 = scmp.lt.s32.totalorder %s542_s12, %s542_s12 }
  0x39   :  { %p549_p5 = por %p548_p4, %p547_p3 }
  0x3a   :  { %464 = vmatpush3.bf16.msra.mxu0 %v461_v16  ;;  %489 = vmatpush3.bf16.msra.mxu1 %v461_v16 }
  0x3b   :  { %466 = vmatprep.subr.bf16.mxu0 %v465_v19  ;;  %482 = vmatprep.subr.bf16.mxu1 %v465_v19  ;;  %p550_p6 = pnand %p549_p5, %p543_p2 }
  0x3e   :  { %468 = vmatpush3.bf16.msra.mxu0 %v465_v19  ;;  %490 = vmatpush3.bf16.msra.mxu1 %v465_v19 }
  0x3f   :  { %470 = vmatprep.subr.bf16.mxu0 %v469_v22  ;;  %483 = vmatprep.subr.bf16.mxu1 %v469_v22 }
  0x42   :  { %472 = vmatpush3.bf16.msra.mxu0 %v469_v22  ;;  %491 = vmatpush3.bf16.msra.mxu1 %v469_v22 }
  0x43   :  { %474 = vmatprep.subr.bf16.mxu0 %v473_v25  ;;  %484 = vmatprep.subr.bf16.mxu1 %v473_v25 }
  0x46   :  { %476 = vmatpush3.bf16.msra.mxu0 %v473_v25  ;;  %492 = vmatpush3.bf16.msra.mxu1 %v473_v25 }
  0x49   :  { %407 = vmatmul.mubr.f32.vlgmr.msra.gmra.mrb[0].mxu0 %v44_v26  ;;  %428 = vmatmul.mubr.f32.vlgmr.msra.gmra.mrb[0].mxu1 %v58_v27 }
  0x4a   :  { %409 = vmatprep.mubr.f32.mxu0 %v45_v28  ;;  %430 = vmatprep.mubr.f32.mxu1 %v59_v29 }
  0x4d   :  { %410 = vmatmul.mubr.f32.gmra.mrb[2].mxu0 %v46_v30  ;;  %431 = vmatmul.mubr.f32.gmra.mrb[2].mxu1 %v60_v31 }
  0x4e   :  { %412 = vmatprep.mubr.f32.mxu0 %v47_v32  ;;  %433 = vmatprep.mubr.f32.mxu1 %v61_v33 }
  0x51   :  { %413 = vmatmul.mubr.f32.gmra.mrb[4].mxu0 %v48_v34  ;;  %434 = vmatmul.mubr.f32.gmra.mrb[4].mxu1 %v62_v35 }
  0x52   :  { %415 = vmatprep.mubr.f32.mxu0 %v49_v36  ;;  %436 = vmatprep.mubr.f32.mxu1 %v63_v37 }
  0x55   :  { %416 = vmatmul.mubr.f32.gmra.mrb[6].mxu0 %v50_v38  ;;  %437 = vmatmul.mubr.f32.gmra.mrb[6].mxu1 %v64_v39 }
  0x56   :  { %418 = vmatprep.mubr.f32.mxu0 %v51_v40  ;;  %439 = vmatprep.mubr.f32.mxu1 %v65_v41 }
  0x59   :  { %419 = vmatmul.mubr.f32.gmra.mrb[8].mxu0 %v52_v42  ;;  %440 = vmatmul.mubr.f32.gmra.mrb[8].mxu1 %v66_v43 }
  0x5a   :  { %421 = vmatprep.mubr.f32.mxu0 %v53_v44  ;;  %442 = vmatprep.mubr.f32.mxu1 %v67_v45 }
  0x5d   :  { %422 = vmatmul.mubr.f32.gmra.mrb[10].mxu0 %v54_v46  ;;  %443 = vmatmul.mubr.f32.gmra.mrb[10].mxu1 %v68_v47 }
  0x5e   :  { %424 = vmatprep.mubr.f32.mxu0 %v55_v48 }
  0x61   :  { %425 = vmatmul.mubr.f32.gmra.mrb[12].mxu0 %v56_v49 }
 0x11c   :  { %v408_v51 = vpop.f32.mrb[0].mxu0  ;;  %v429_v52 = vpop.f32.mrb[0].mxu1 }
 0x11d   :  { %v164_v53 = vadd.f32 %v408_v51, %v628_v50  ;;  %v158_v54 = vpop.f32.mrb[1].mxu0  ;;  %v234_v55 = vadd.f32 %v429_v52, %v628_v50  ;;  %v228_v56 = vpop.f32.mrb[1].mxu1 }
 0x11e   :  { %v159_v57 = vadd.f32 %v628_v50, %v158_v54  ;;  %v229_v58 = vadd.f32 %v628_v50, %v228_v56 }
 0x11f   :  { %288 = vst [vmem:[#allocation7 + $0x8] sm:$0xff] %v164_v53  ;;  %302 = vst [vmem:[#allocation7 + $0x78] sm:$0xff] %v234_v55 }
 0x120   :  { %287 = vst [vmem:[#allocation7] sm:$0xff] %v159_v57  ;;  %v411_v59 = vpop.f32.mrb[2].mxu0  ;;  %301 = vst [vmem:[#allocation7 + $0x70] sm:$0xff] %v229_v58  ;;  %v432_v60 = vpop.f32.mrb[2].mxu1 }
 0x121   :  { %v174_v61 = vadd.f32 %v411_v59, %v628_v50  ;;  %v168_v62 = vpop.f32.mrb[3].mxu0  ;;  %v244_v63 = vadd.f32 %v432_v60, %v628_v50  ;;  %v238_v0 = vpop.f32.mrb[3].mxu1 }
 0x122   :  { %v169_v1 = vadd.f32 %v628_v50, %v168_v62  ;;  %v239_v2 = vadd.f32 %v628_v50, %v238_v0 }
 0x123   :  { %290 = vst [vmem:[#allocation7 + $0x18] sm:$0xff] %v174_v61  ;;  %304 = vst [vmem:[#allocation7 + $0x88] sm:$0xff] %v244_v63 }
 0x124   :  { %289 = vst [vmem:[#allocation7 + $0x10] sm:$0xff] %v169_v1  ;;  %v414_v3 = vpop.f32.mrb[4].mxu0  ;;  %303 = vst [vmem:[#allocation7 + $0x80] sm:$0xff] %v239_v2  ;;  %v435_v4 = vpop.f32.mrb[4].mxu1 }
 0x125   :  { %v184_v5 = vadd.f32 %v414_v3, %v628_v50  ;;  %v178_v6 = vpop.f32.mrb[5].mxu0  ;;  %v254_v7 = vadd.f32 %v435_v4, %v628_v50  ;;  %v248_v8 = vpop.f32.mrb[5].mxu1 }
 0x126   :  { %v179_v9 = vadd.f32 %v628_v50, %v178_v6  ;;  %v249_v10 = vadd.f32 %v628_v50, %v248_v8 }
 0x127   :  { %292 = vst [vmem:[#allocation7 + $0x28] sm:$0xff] %v184_v5  ;;  %306 = vst [vmem:[#allocation7 + $0x98] sm:$0xff] %v254_v7 }
 0x128   :  { %291 = vst [vmem:[#allocation7 + $0x20] sm:$0xff] %v179_v9  ;;  %v417_v11 = vpop.f32.mrb[6].mxu0  ;;  %305 = vst [vmem:[#allocation7 + $0x90] sm:$0xff] %v249_v10  ;;  %v438_v12 = vpop.f32.mrb[6].mxu1 }
 0x129   :  { %v194_v13 = vadd.f32 %v417_v11, %v628_v50  ;;  %v188_v14 = vpop.f32.mrb[7].mxu0  ;;  %v264_v15 = vadd.f32 %v438_v12, %v628_v50  ;;  %v258_v16 = vpop.f32.mrb[7].mxu1 }
 0x12a   :  { %v189_v17 = vadd.f32 %v628_v50, %v188_v14  ;;  %v259_v18 = vadd.f32 %v628_v50, %v258_v16 }
 0x12b   :  { %294 = vst [vmem:[#allocation7 + $0x38] sm:$0xff] %v194_v13  ;;  %308 = vst [vmem:[#allocation7 + $0xa8] sm:$0xff] %v264_v15 }
 0x12c   :  { %293 = vst [vmem:[#allocation7 + $0x30] sm:$0xff] %v189_v17  ;;  %v420_v19 = vpop.f32.mrb[8].mxu0  ;;  %307 = vst [vmem:[#allocation7 + $0xa0] sm:$0xff] %v259_v18  ;;  %v441_v20 = vpop.f32.mrb[8].mxu1 }
 0x12d   :  { %v204_v21 = vadd.f32 %v420_v19, %v628_v50  ;;  %v198_v22 = vpop.f32.mrb[9].mxu0  ;;  %v274_v23 = vadd.f32 %v441_v20, %v628_v50  ;;  %v268_v24 = vpop.f32.mrb[9].mxu1 }
 0x12e   :  { %v199_v25 = vadd.f32 %v628_v50, %v198_v22  ;;  %v269_v26 = vadd.f32 %v628_v50, %v268_v24 }
 0x12f   :  { %296 = vst [vmem:[#allocation7 + $0x48] sm:$0xff] %v204_v21  ;;  %310 = vst [vmem:[#allocation7 + $0xb8] sm:$0xff] %v274_v23 }
 0x130   :  { %295 = vst [vmem:[#allocation7 + $0x40] sm:$0xff] %v199_v25  ;;  %v423_v27 = vpop.f32.mrb[10].mxu0  ;;  %309 = vst [vmem:[#allocation7 + $0xb0] sm:$0xff] %v269_v26  ;;  %v444_v28 = vpop.f32.mrb[10].mxu1 }
 0x131   :  { %v214_v29 = vadd.f32 %v423_v27, %v628_v50  ;;  %v208_v30 = vpop.f32.mrb[11].mxu0  ;;  %v284_v31 = vadd.f32 %v444_v28, %v628_v50  ;;  %v278_v32 = vpop.f32.mrb[11].mxu1 }
 0x132   :  { %v209_v33 = vadd.f32 %v628_v50, %v208_v30  ;;  %v279_v34 = vadd.f32 %v628_v50, %v278_v32 }
 0x133   :  { %298 = vst [vmem:[#allocation7 + $0x58] sm:$0xff] %v214_v29  ;;  %312 = vst [vmem:[#allocation7 + $0xc8] sm:$0xff] %v284_v31 }
 0x134   :  { %297 = vst [vmem:[#allocation7 + $0x50] sm:$0xff] %v209_v33  ;;  %v426_v35 = vpop.f32.mrb[12].mxu0  ;;  %311 = vst [vmem:[#allocation7 + $0xc0] sm:$0xff] %v279_v34 }
 0x135   :  { %v224_v36 = vadd.f32 %v426_v35, %v628_v50  ;;  %v218_v37 = vpop.f32.mrb[13].mxu0 }
 0x136   :  { %v219_v38 = vadd.f32 %v628_v50, %v218_v37 }
 0x137   :  { %300 = vst [vmem:[#allocation7 + $0x68] sm:$0xff] %v224_v36 }
 0x138   :  { %299 = vst [vmem:[#allocation7 + $0x60] sm:$0xff] %v219_v38 }
 0x139   :  { %553 = shalt.err (!%p550_p6)
}
 0x13a   :  { %s554_s15 = scalar_lea.hbm %s674_s3, 3328 }
 0x13b   :  { %p555_p7 = scmp.ne.s32.totalorder %s674_s3, %s554_s15  ;;  %p558_p8 = scmp.lt.u32.totalorder %s554_s15, %s674_s3 }
 0x13d   :  { %p560_p9 = pnand %p558_p8, %p555_p7 }
 0x13f   :  { %563 = shalt.err (!%p560_p9)
}
 0x140   :  { %324 = dma.vmem_to_hbm [thread:$0]  %s319_s11, 3328, %s674_s3, [#allocation4], %s571_s22, %s571_s22, %s572_s23  }
 0x141   :  { %568 = dma.done.wait [#allocation4], 3328  }
 0x142   :  { %569 = vsyncadd [#allocation4], 4294963968 }
 0x143   :  { %328 = vsyncpa [#allocation3], 1 }
 0x144   :  { %329 = vsyncpa [#allocation6], 1 }
 0x145   :  { %330 = vsyncpa [#allocation4], 1 }

</bundles_post_ra>
